<compile_context>
chip_gen: v7x
topology: tpu7x:2x2x1
jax: 0.10.0
libtpu: 0.0.40
codegen_flags: <defaults>
</compile_context>

<pallas_src>
import functools

import jax
import jax.numpy as jnp
import numpy as np
from jax.experimental import pallas as pl
from jax.experimental.pallas import tpu as pltpu


def _dilate_block_mask(m, block_size):
    """Separable DropBlock dilation.

    m: (H, W, Bt) float32 with values in {0, 1}.
    Returns block_mask of the same shape:
        bm[h, w, b] = max_{0 <= dh, dw < bs} m[h - dh, w - dw, b]
    (out-of-range reads count as 0), i.e. every seed covers the
    block_size x block_size block extending down/right, clipped at H, W.
    """
    bs = int(block_size)
    if bs <= 1:
        return m
    H, W, _ = m.shape

    # W pass (sublane axis): running max of down-shifted copies.
    acc_w = m
    for dw in range(1, min(bs, W)):
        shifted = jnp.concatenate(
            [jnp.zeros_like(m[:, :dw, :]), m[:, : W - dw, :]], axis=1)
        acc_w = jnp.maximum(acc_w, shifted)

    # H pass (leading axis): whole (W, Bt)-plane moves, no cross-lane work.
    acc = acc_w
    for dh in range(1, min(bs, H)):
        shifted = jnp.concatenate(
            [jnp.zeros_like(acc_w[:dh]), acc_w[: H - dh]], axis=0)
        acc = jnp.maximum(acc, shifted)
    return acc


def _count_kernel(mask_ref, psum_ref, *, block_size):
    """Pass 1: per-B-tile partial sum of inv = 1 - block_mask."""
    m = mask_ref[...].astype(jnp.float32)          # bf16 {0,1} -> f32 (v5e-safe)
    bm = _dilate_block_mask(m, block_size)
    inv_sum = jnp.sum(1.0 - bm)                    # exact: integer-valued, < 2^24
    psum_ref[...] = jnp.broadcast_to(inv_sum, psum_ref.shape).astype(jnp.float32)


def _apply_kernel(scale_ref, x_ref, mask_ref, o_ref, *, block_size):
    """Pass 2: out = (1 - block_mask) * x * scale (dilation recomputed)."""
    scale = scale_ref[0, 0]                        # f32 scalar from SMEM
    m = mask_ref[...].astype(jnp.float32)
    bm = _dilate_block_mask(m, block_size)
    o_ref[...] = ((1.0 - bm) * x_ref[...].astype(jnp.float32) * scale).astype(
        o_ref.dtype)


def _pick_lane_tile(B, H, W):
    """Lane-dim (N*C) tile: multiple of 128 dividing B, sized so one f32
    (H, W, bt) slab stays ~1 MiB (safe under default scoped VMEM on
    v5e/v6e/v7x once double-buffering and compute temporaries are counted).

    TODO(synk): for very large H*W (>= ~112x112) even bt=128 over-fills VMEM;
    that regime would need H-tiling with a (block_size-1)-row halo.
    """
    if B % 128 != 0:
        return B                                    # small/ragged batch: one tile
    budget_elems = (1024 * 1024) // 4               # ~1 MiB of f32 per slab
    bt = (budget_elems // (H * W)) // 128 * 128
    bt = max(128, min(bt, B))
    while B % bt != 0:
        bt -= 128
    return bt


def dropblock(x, mask, block_size, training=True):
    """x, mask: (N, C, H, W) float32. mask holds the Bernoulli(gamma) samples."""
    if not training:
        return x
    N, C, H, W = x.shape
    B = N * C

    # Lane-dense layout: N*C on lanes, (H, W) on leading/sublane axes.
    x_l = jnp.transpose(x.reshape(B, H, W), (1, 2, 0))                  # (H, W, B) f32
    m_l = jnp.transpose(mask.reshape(B, H, W), (1, 2, 0)).astype(jnp.bfloat16)

    bt = _pick_lane_tile(B, H, W)
    ntiles = B // bt
    total = float(N * C * H * W)
    bs = int(block_size)

    cparams = pltpu.CompilerParams(
        dimension_semantics=("parallel",),          # shard B-tiles across v7x's 2 TCs
        vmem_limit_bytes=32 * 1024 * 1024,          # default on v6e/v7x; raises v5e
    )

    # ---- Pass 1: partial sums of inv over each B tile ----------------------
    psums = pl.pallas_call(
        functools.partial(_count_kernel, block_size=bs),
        out_shape=jax.ShapeDtypeStruct((ntiles, 8, 128), jnp.float32),
        grid=(ntiles,),
        in_specs=[pl.BlockSpec((H, W, bt), lambda i: (0, 0, i))],
        out_specs=pl.BlockSpec((1, 8, 128), lambda i: (i, 0, 0)),
        compiler_params=cparams,
    )(m_l)

    count_ones = jnp.sum(psums[:, 0, 0])
    # NOTE: mirrors the PyTorch module — if every element is dropped
    # (count_ones == 0) the scale becomes inf, just like countM / 0 in torch.
    scale = (jnp.asarray(total, dtype=jnp.float32) / count_ones).reshape(1, 1)

    # ---- Pass 2: apply (1 - block_mask) * x * scale -------------------------
    out_l = pl.pallas_call(
        functools.partial(_apply_kernel, block_size=bs),
        out_shape=jax.ShapeDtypeStruct((H, W, B), x.dtype),
        grid=(ntiles,),
        in_specs=[
            pl.BlockSpec(memory_space=pltpu.MemorySpace.SMEM),   # scale (1, 1)
            pl.BlockSpec((H, W, bt), lambda i: (0, 0, i)),       # x
            pl.BlockSpec((H, W, bt), lambda i: (0, 0, i)),       # mask
        ],
        out_specs=pl.BlockSpec((H, W, bt), lambda i: (0, 0, i)),
        compiler_params=cparams,
    )(scale, x_l, m_l)

    return jnp.transpose(out_l, (2, 0, 1)).reshape(N, C, H, W)


def dropblock_ref(x, mask, block_size):
    """Pure numpy reference mirroring the PyTorch scatter-based dilation."""
    x = np.asarray(x, dtype=np.float64)
    mask = np.asarray(mask, dtype=np.float64)
    N, C, H, W = x.shape
    block_mask = mask.copy()
    if block_size > 1:
        for n, c, h, w in np.argwhere(mask != 0):
            block_mask[n, c, h:h + block_size, w:w + block_size] = 1.0
    inv = 1.0 - block_mask
    countM = N * C * H * W
    count_ones = inv.sum()
    return inv * x * (countM / count_ones)


if __name__ == "__main__":
    N, C, H, W = 2, 4, 16, 16
    block_size = 3
    gamma = 0.1

    key = jax.random.PRNGKey(0)
    kx, km = jax.random.split(key)
    x = jax.random.normal(kx, (N, C, H, W), dtype=jnp.float32)
    # TODO(synk): PyTorch's Bernoulli RNG stream cannot be reproduced; sample
    # the Bernoulli(gamma) mask with jax.random as glue and feed it to the kernel.
    mask = jax.random.bernoulli(km, gamma, (N, C, H, W)).astype(jnp.float32)

    out = dropblock(x, mask, block_size, training=True)
    out = jax.block_until_ready(out)

    ref = dropblock_ref(x, mask, block_size)
    np.testing.assert_allclose(np.asarray(out, dtype=np.float64), ref,
                               rtol=1e-5, atol=1e-5)
    print("KERNEL_OK")
</pallas_src>

<mosaic_0001>
module attributes {stable_mosaic.version = 11 : i64} {
  func.func @_count_kernel(%arg0: i32, %arg1: memref<16x16x8xbf16, #tpu.memory_space<vmem>>, %arg2: memref<1x8x128xf32, #tpu.memory_space<vmem>>) attributes {dimension_semantics = [#tpu.dimension_semantics<parallel>], iteration_bounds = array<i64: 1>, scalar_prefetch = 0 : i64, scratch_operands = 0 : i64, tpu.core_type = #tpu.core_type<tc>, window_params = [{transform_indices = @transform_0, window_bounds = array<i64: 16, 16, 8>}, {transform_indices = @transform_1, window_bounds = array<i64: 1, 8, 128>}]} {
    %c0 = arith.constant 0 : index
    %c0_0 = arith.constant 0 : index
    %c0_1 = arith.constant 0 : index
    %0 = vector.load %arg1[%c0, %c0_0, %c0_1] : memref<16x16x8xbf16, #tpu.memory_space<vmem>>, vector<16x16x8xbf16>
    %1 = arith.extf %0 : vector<16x16x8xbf16> to vector<16x16x8xf32>
    %cst = arith.constant 0.000000e+00 : f32
    %2 = vector.broadcast %cst : f32 to vector<16x1x8xf32>
    %3 = vector.extract_strided_slice %1 {offsets = [0, 0, 0], sizes = [16, 15, 8], strides = [1, 1, 1]} : vector<16x16x8xf32> to vector<16x15x8xf32>
    %4 = tpu.concatenate %2, %3 in 1 : vector<16x1x8xf32>, vector<16x15x8xf32> -> vector<16x16x8xf32>
    %5 = arith.maximumf %1, %4 : vector<16x16x8xf32>
    %cst_2 = arith.constant 0.000000e+00 : f32
    %6 = vector.broadcast %cst_2 : f32 to vector<16x2x8xf32>
    %7 = vector.extract_strided_slice %1 {offsets = [0, 0, 0], sizes = [16, 14, 8], strides = [1, 1, 1]} : vector<16x16x8xf32> to vector<16x14x8xf32>
    %8 = tpu.concatenate %6, %7 in 1 : vector<16x2x8xf32>, vector<16x14x8xf32> -> vector<16x16x8xf32>
    %9 = arith.maximumf %5, %8 : vector<16x16x8xf32>
    %cst_3 = arith.constant 0.000000e+00 : f32
    %10 = vector.broadcast %cst_3 : f32 to vector<1x16x8xf32>
    %11 = vector.extract_strided_slice %9 {offsets = [0, 0, 0], sizes = [15, 16, 8], strides = [1, 1, 1]} : vector<16x16x8xf32> to vector<15x16x8xf32>
    %12 = tpu.concatenate %10, %11 in 0 : vector<1x16x8xf32>, vector<15x16x8xf32> -> vector<16x16x8xf32>
    %13 = arith.maximumf %9, %12 : vector<16x16x8xf32>
    %cst_4 = arith.constant 0.000000e+00 : f32
    %14 = vector.broadcast %cst_4 : f32 to vector<2x16x8xf32>
    %15 = vector.extract_strided_slice %9 {offsets = [0, 0, 0], sizes = [14, 16, 8], strides = [1, 1, 1]} : vector<16x16x8xf32> to vector<14x16x8xf32>
    %16 = tpu.concatenate %14, %15 in 0 : vector<2x16x8xf32>, vector<14x16x8xf32> -> vector<16x16x8xf32>
    %17 = arith.maximumf %13, %16 : vector<16x16x8xf32>
    %cst_5 = arith.constant 1.000000e+00 : f32
    %18 = vector.broadcast %cst_5 : f32 to vector<16x16x8xf32>
    %19 = arith.subf %18, %17 : vector<16x16x8xf32>
    %20 = vector.shape_cast %19 : vector<16x16x8xf32> to vector<1x16x16x8xf32>
    %cst_6 = arith.constant dense<0.000000e+00> : vector<1xf32>
    %21 = vector.multi_reduction <add>, %20, %cst_6 [1, 2, 3] : vector<1x16x16x8xf32> to vector<1xf32>
    %22 = vector.shape_cast %21 : vector<1xf32> to vector<1x1x1x1xf32>
    %23 = vector.extract %22[0, 0, 0, 0] : f32 from vector<1x1x1x1xf32>
    %24 = vector.broadcast %23 : f32 to vector<1x8x128xf32>
    %c0_7 = arith.constant 0 : index
    %c0_8 = arith.constant 0 : index
    %c0_9 = arith.constant 0 : index
    %25 = vector.load %arg2[%c0_7, %c0_8, %c0_9] : memref<1x8x128xf32, #tpu.memory_space<vmem>>, vector<1x8x128xf32>
    tpu.vector_store %arg2[%c0_7, %c0_8, %c0_9], %24 {strides = array<i32>} : memref<1x8x128xf32, #tpu.memory_space<vmem>>, vector<1x8x128xf32>,
    return
  }
  func.func @transform_0(%arg0: i32) -> (i32, i32, i32) {
    %c0_i32 = arith.constant 0 : i32
    %c0_i32_0 = arith.constant 0 : i32
    %c0_i32_1 = arith.constant 0 : i32
    return %c0_i32, %c0_i32_0, %arg0 : i32, i32, i32
  }
  func.func @transform_1(%arg0: i32) -> (i32, i32, i32) {
    %c0_i32 = arith.constant 0 : i32
    %c0_i32_0 = arith.constant 0 : i32
    %c0_i32_1 = arith.constant 0 : i32
    return %arg0, %c0_i32, %c0_i32_0 : i32, i32, i32
  }
}

</mosaic_0001>

<bundles_post_ra>
// kernel: tpu_custom_call.1
= control target key start
LH: loop header
LB: loop body
LE: loop exit
PB: predicated region body
PF: predicated region fallthrough
CT: control target
= control target key end

     0   :  { %6 = vsyncpa [#allocation3], 0  ;;  %vm105_vm0 = vcmask 1040384   ;;  %vm234_vm1 = vcmask 1041408   ;;  %vm459_vm2 = vcmask 64512   ;;  %s1231_s0 = inlined_call_operand.vmem [shape: bf16[16,16,8], index: 0, kind: input, shape index: {}]   ;;  %s1232_s1 = inlined_call_operand.hbm [shape: f32[1,8,128], index: 1, kind: output, shape index: {}]  }
   0x1   :  { %v549_v0 = vld [vmem:[%s1231_s0] sm:$0xff]   ;;  %v612_v1 = vld [vmem:[%s1231_s0 + $0x8] sm:$0xff]   ;;  %v613_v2 = vld [vmem:[%s1231_s0 + $0x10] sm:$0xff]  }
   0x2   :  { %v614_v3 = vld [vmem:[%s1231_s0 + $0x18] sm:$0xff]   ;;  %v615_v4 = vld [vmem:[%s1231_s0 + $0x20] sm:$0xff]   ;;  %v680_v5 = vunpack.c.l.bf16 %v549_v0  ;;  %v682_v6 = vunpack.c.h.bf16 %v549_v0  ;;  %v616_v7 = vld [vmem:[%s1231_s0 + $0x28] sm:$0xff]   ;;  %v690_v9 = vunpack.c.l.bf16 %v612_v1  ;;  %v692_v10 = vunpack.c.h.bf16 %v612_v1 }
   0x3   :  { %v617_v8 = vld [vmem:[%s1231_s0 + $0x30] sm:$0xff]   ;;  %v694_v11 = vunpack.c.l.bf16 %v613_v2  ;;  %v696_v12 = vunpack.c.h.bf16 %v613_v2  ;;  %v618_v13 = vld [vmem:[%s1231_s0 + $0x38] sm:$0xff]   ;;  %v619_v14 = vld [vmem:[%s1231_s0 + $0x40] sm:$0xff]   ;;  %v704_v15 = vunpack.c.l.bf16 %v614_v3  ;;  %v706_v16 = vunpack.c.h.bf16 %v614_v3 }
   0x4   :  { %v708_v17 = vunpack.c.l.bf16 %v615_v4  ;;  %v710_v18 = vunpack.c.h.bf16 %v615_v4  ;;  %v620_v19 = vld [vmem:[%s1231_s0 + $0x48] sm:$0xff]   ;;  %v621_v20 = vld [vmem:[%s1231_s0 + $0x50] sm:$0xff]   ;;  %v718_v21 = vunpack.c.l.bf16 %v616_v7  ;;  %v720_v22 = vunpack.c.h.bf16 %v616_v7  ;;  %v622_v25 = vld [vmem:[%s1231_s0 + $0x58] sm:$0xff]  }
   0x5   :  { %v722_v23 = vunpack.c.l.bf16 %v617_v8  ;;  %v724_v24 = vunpack.c.h.bf16 %v617_v8  ;;  %v623_v26 = vld [vmem:[%s1231_s0 + $0x60] sm:$0xff]   ;;  %v732_v27 = vunpack.c.l.bf16 %v618_v13  ;;  %v734_v28 = vunpack.c.h.bf16 %v618_v13  ;;  %v624_v31 = vld [vmem:[%s1231_s0 + $0x68] sm:$0xff]   ;;  %v625_v36 = vld [vmem:[%s1231_s0 + $0x70] sm:$0xff]  }
   0x6   :  { %v736_v29 = vunpack.c.l.bf16 %v619_v14  ;;  %v738_v30 = vunpack.c.h.bf16 %v619_v14  ;;  %v743_v32 = vunpack.c.l.bf16 %v620_v19  ;;  %v745_v33 = vunpack.c.h.bf16 %v620_v19  ;;  %v626_v41 = vld [vmem:[%s1231_s0 + $0x78] sm:$0xff]   ;;  %s654_s0 = smov [#allocation2]  }
   0x7   :  { %v747_v34 = vunpack.c.l.bf16 %v621_v20  ;;  %v749_v35 = vunpack.c.h.bf16 %v621_v20  ;;  %v754_v37 = vunpack.c.l.bf16 %v622_v25  ;;  %v756_v38 = vunpack.c.h.bf16 %v622_v25  ;;  %s540_s9 = sshll.u32 %s654_s0, 4  ;;  %s541_s9 = int_to_ptr.vmem [resolvable:$true] %s540_s9 }
   0x8   :  { %v758_v39 = vunpack.c.l.bf16 %v623_v26  ;;  %v760_v40 = vunpack.c.h.bf16 %v623_v26  ;;  %v765_v42 = vunpack.c.l.bf16 %v624_v31  ;;  %v767_v43 = vunpack.c.h.bf16 %v624_v31  ;;  %s630_s11 = scalar_lea.vmem %s541_s9, 128  ;;  %p635_p1 = scmp.lt.s32.totalorder %s541_s9, %s541_s9 }
   0x9   :  { %v106_v44 = vrot.slane %v680_v5, 7  ;;  %v107_v45 = vrot.slane %v682_v6, 7  ;;  %v771_v46 = vunpack.c.l.bf16 %v625_v36  ;;  %v110_v47 = vrot.slane %v692_v10, 7  ;;  %p631_p0 = scmp.ne.s32.totalorder %s541_s9, %s630_s11  ;;  %p636_p2 = scmp.lt.s32.totalorder %s630_s11, %s630_s11 }
   0xa   :  { %1258 = vst [vmem:[#allocation5_spill] sm:$0xff] %v758_v39  ;;  %1259 = vst [vmem:[#allocation6_spill] sm:$0xff] %v760_v40  ;;  %v113_v48 = vrot.slane %v696_v12, 7  ;;  %v116_v49 = vrot.slane %v706_v16, 7  ;;  %v776_v50 = vunpack.c.h.bf16 %v625_v36  ;;  %v778_v51 = vunpack.c.l.bf16 %v626_v41 }
   0xb   :  { %1260 = vst [vmem:[#allocation7_spill] sm:$0xff] %v765_v42  ;;  %1261 = vst [vmem:[#allocation8_spill] sm:$0xff] %v767_v43  ;;  %v119_v52 = vrot.slane %v710_v18, 7  ;;  %v122_v53 = vrot.slane %v720_v22, 7  ;;  %v782_v54 = vunpack.c.h.bf16 %v626_v41  ;;  %v109_v55 = vrot.slane %v690_v9, 7  ;;  %p637_p3 = por %p636_p2, %p635_p1 }
   0xc   :  { %1262 = vst [vmem:[#allocation9_spill] sm:$0xff] %v771_v46  ;;  %1263 = vst [vmem:[#allocation10_spill] sm:$0xff] %v776_v50  ;;  %v112_v56 = vrot.slane %v694_v11, 7  ;;  %v115_v57 = vrot.slane %v704_v15, 7  ;;  %v788_v58 = vsel %vm105_vm0, %v106_v44, %v107_v45  ;;  %v118_v59 = vrot.slane %v708_v17, 7 }
   0xd   :  { %1264 = vst [vmem:[#allocation11_spill] sm:$0xff] %v778_v51  ;;  %1265 = vst [vmem:[#allocation12_spill] sm:$0xff] %v782_v54  ;;  %v121_v60 = vrot.slane %v718_v21, 7  ;;  %v125_v61 = vrot.slane %v724_v24, 7  ;;  %v794_v62 = vsel %vm105_vm0, %v109_v55, %v110_v47  ;;  %v128_v1 = vrot.slane %v734_v28, 7  ;;  %p638_p4 = pnand %p637_p3, %p631_p0 }
   0xe   :  { %v797_v63 = vsel %vm105_vm0, %v112_v56, %v113_v48  ;;  %v800_v0 = vsel %vm105_vm0, %v115_v57, %v116_v49  ;;  %v804_v2 = vsel %vm105_vm0, %v118_v59, %v119_v52  ;;  %v124_v4 = vrot.slane %v722_v23, 7 }
   0xf   :  { %v807_v3 = vsel %vm105_vm0, %v121_v60, %v122_v53  ;;  %v127_v7 = vrot.slane %v732_v27, 7  ;;  %v130_v8 = vrot.slane %v736_v29, 7  ;;  %v131_v13 = vrot.slane %v738_v30, 7 }
  0x10   :  { %v134_v14 = vrot.slane %v745_v33, 7  ;;  %v137_v19 = vrot.slane %v749_v35, 7  ;;  %v816_v20 = vsel %vm105_vm0, %v124_v4, %v125_v61  ;;  %v140_v25 = vrot.slane %v756_v38, 7 }
  0x11   :  { %v143_v26 = vrot.slane %v760_v40, 7  ;;  %v146_v31 = vrot.slane %v767_v43, 7  ;;  %v822_v36 = vsel %vm105_vm0, %v127_v7, %v128_v1  ;;  %v133_v41 = vrot.slane %v743_v32, 7 }
  0x12   :  { %v136_v45 = vrot.slane %v747_v34, 7  ;;  %v149_v47 = vrot.slane %v776_v50, 7  ;;  %v139_v48 = vrot.slane %v754_v37, 7  ;;  %v142_v49 = vrot.slane %v758_v39, 7 }
  0x13   :  { %v145_v52 = vrot.slane %v765_v42, 7  ;;  %v152_v53 = vrot.slane %v782_v54, 7  ;;  %v832_v61 = vsel %vm105_vm0, %v130_v8, %v131_v13  ;;  %v835_v1 = vsel %vm105_vm0, %v133_v41, %v134_v14 }
  0x14   :  { %v838_v43 = vsel %vm105_vm0, %v136_v45, %v137_v19  ;;  %v148_v50 = vrot.slane %v771_v46, 7  ;;  %v842_v40 = vsel %vm105_vm0, %v139_v48, %v140_v25  ;;  %v845_v39 = vsel %vm105_vm0, %v142_v49, %v143_v26 }
  0x15   :  { %1266 = vst [vmem:[#allocation13_spill] sm:$0xff] %v838_v43  ;;  %1267 = vst [vmem:[#allocation14_spill] sm:$0xff] %v842_v40  ;;  %v848_v54 = vsel %vm105_vm0, %v145_v52, %v146_v31  ;;  %v151_v13 = vrot.slane %v778_v51, 7  ;;  %v186_v14 = vsel %vm105_vm0, 0.0, %v106_v44  ;;  %v187_v19 = vsel %vm105_vm0, 0.0, %v109_v55 }
  0x16   :  { %1268 = vst [vmem:[#allocation15_spill] sm:$0xff] %v845_v39  ;;  %1269 = vst [vmem:[#allocation16_spill] sm:$0xff] %v848_v54  ;;  %v852_v42 = vsel %vm105_vm0, %v148_v50, %v149_v47  ;;  %v188_v46 = vsel %vm105_vm0, 0.0, %v112_v56  ;;  %v861_v26 = vsel %vm105_vm0, 0.0, %v115_v57  ;;  %v864_v31 = vsel %vm105_vm0, 0.0, %v118_v59 }
  0x17   :  { %1270 = vst [vmem:[#allocation17_spill] sm:$0xff] %v852_v42  ;;  %v858_v25 = vsel %vm105_vm0, %v151_v13, %v152_v53  ;;  %v867_v51 = vsel %vm105_vm0, 0.0, %v121_v60  ;;  %v870_v47 = vsel %vm105_vm0, 0.0, %v124_v4  ;;  %v873_v44 = vsel %vm105_vm0, 0.0, %v127_v7 }
  0x18   :  { %1271 = vst [vmem:[#allocation18_spill] sm:$0xff] %v858_v25  ;;  %v876_v55 = vsel %vm105_vm0, 0.0, %v130_v8  ;;  %v879_v56 = vsel %vm105_vm0, 0.0, %v133_v41  ;;  %v882_v57 = vsel %vm105_vm0, 0.0, %v136_v45  ;;  %v885_v59 = vsel %vm105_vm0, 0.0, %v139_v48 }
  0x19   :  { %1272 = vst [vmem:[#allocation19_spill] sm:$0xff] %v885_v59  ;;  %v888_v60 = vsel %vm105_vm0, 0.0, %v142_v49  ;;  %v891_v4 = vsel %vm105_vm0, 0.0, %v145_v52  ;;  %v894_v7 = vsel %vm105_vm0, 0.0, %v148_v50  ;;  %v235_v8 = vrot.slane %v680_v5, 6 }
  0x1a   :  { %1273 = vst [vmem:[#allocation20_spill] sm:$0xff] %v888_v60  ;;  %1274 = vst [vmem:[#allocation21_spill] sm:$0xff] %v891_v4  ;;  %v236_v41 = vrot.slane %v682_v6, 6  ;;  %v238_v53 = vrot.slane %v690_v9, 6  ;;  %v900_v45 = vsel %vm105_vm0, 0.0, %v151_v13  ;;  %v202_v48 = vmax.f32 %v680_v5, %v186_v14 }
  0x1b   :  { %1275 = vst [vmem:[#allocation22_spill] sm:$0xff] %v894_v7  ;;  %1276 = vst [vmem:[#allocation23_spill] sm:$0xff] %v900_v45  ;;  %v203_v49 = vmax.f32 %v682_v6, %v788_v58  ;;  %v204_v52 = vmax.f32 %v690_v9, %v187_v19  ;;  %v205_v50 = vmax.f32 %v692_v10, %v794_v62  ;;  %v239_v7 = vrot.slane %v692_v10, 6 }
  0x1c   :  { %v206_v25 = vmax.f32 %v694_v11, %v188_v46  ;;  %v207_v42 = vmax.f32 %v696_v12, %v797_v63  ;;  %v208_v13 = vmax.f32 %v704_v15, %v861_v26  ;;  %v209_v5 = vmax.f32 %v706_v16, %v800_v0 }
  0x1d   :  { %v210_v6 = vmax.f32 %v708_v17, %v864_v31  ;;  %v237_v58 = vsel %vm234_vm1, %v235_v8, %v236_v41  ;;  %v241_v46 = vrot.slane %v694_v11, 6  ;;  %v315_v62 = vsel %vm234_vm1, 0.0, %v235_v8 }
  0x1e   :  { %v316_v10 = vsel %vm234_vm1, 0.0, %v238_v53  ;;  %v240_v11 = vsel %vm234_vm1, %v238_v53, %v239_v7  ;;  %v242_v31 = vrot.slane %v696_v12, 6  ;;  %v244_v8 = vrot.slane %v704_v15, 6 }
  0x1f   :  { %v331_v63 = vmax.f32 %v202_v48, %v315_v62  ;;  %v332_v0 = vmax.f32 %v203_v49, %v237_v58  ;;  %v333_v9 = vmax.f32 %v204_v52, %v316_v10  ;;  %v317_v7 = vsel %vm234_vm1, 0.0, %v241_v46 }
  0x20   :  { %v334_v48 = vmax.f32 %v205_v50, %v240_v11  ;;  %v243_v49 = vsel %vm234_vm1, %v241_v46, %v242_v31  ;;  %v245_v52 = vrot.slane %v706_v16, 6  ;;  %v247_v58 = vrot.slane %v708_v17, 6  ;;  %v1277_v50 = vld [vmem:[#allocation5_spill] sm:$0xff]  ;;  %v1278_v16 = vld [vmem:[#allocation6_spill] sm:$0xff] }
  0x21   :  { %v318_v62 = vsel %vm234_vm1, 0.0, %v244_v8  ;;  %v956_v10 = vmax.f32 %v206_v25, %v317_v7  ;;  %v363_v26 = vmax.f32 %v331_v63, 0.0  ;;  %v364_v19 = vmax.f32 %v332_v0, 0.0  ;;  %v1284_v17 = vld [vmem:[#allocation10_spill] sm:$0xff] }
  0x22   :  { %v365_v12 = vmax.f32 %v333_v9, %v331_v63  ;;  %v248_v25 = vrot.slane %v710_v18, 6  ;;  %v969_v7 = vmax.f32 %v207_v42, %v243_v49  ;;  %v366_v14 = vmax.f32 %v334_v48, %v332_v0 }
  0x23   :  { %v246_v41 = vsel %vm234_vm1, %v244_v8, %v245_v52  ;;  %v250_v15 = vrot.slane %v718_v21, 6  ;;  %v319_v53 = vsel %vm234_vm1, 0.0, %v247_v58  ;;  %v974_v45 = vmax.f32 %v208_v13, %v318_v62  ;;  %v1283_v52 = vld [vmem:[#allocation17_spill] sm:$0xff] }
  0x24   :  { %v367_v46 = vmax.f32 %v956_v10, %v333_v9  ;;  %v395_v60 = vmax.f32 %v363_v26, 0.0  ;;  %v396_v11 = vmax.f32 %v364_v19, 0.0  ;;  %v397_v39 = vmax.f32 %v365_v12, 0.0 }
  0x25   :  { %v251_v59 = vrot.slane %v720_v22, 6  ;;  %v253_v8 = vrot.slane %v722_v23, 6  ;;  %v985_v13 = vmax.f32 %v209_v5, %v246_v41  ;;  %v368_v62 = vmax.f32 %v969_v7, %v334_v48 }
  0x26   :  { %v398_v26 = vmax.f32 %v366_v14, 0.0  ;;  %v249_v19 = vsel %vm234_vm1, %v247_v58, %v248_v25  ;;  %v320_v12 = vsel %vm234_vm1, 0.0, %v250_v15  ;;  %v990_v4 = vmax.f32 %v210_v6, %v319_v53 }
  0x27   :  { %v369_v49 = vmax.f32 %v974_v45, %v956_v10  ;;  %v399_v40 = vmax.f32 %v367_v46, %v331_v63  ;;  %v427_v54 = vsub.f32 1.0, %v395_v60  ;;  %v428_v42 = vsub.f32 1.0, %v396_v11 }
  0x28   :  { %v429_v31 = vsub.f32 1.0, %v397_v39  ;;  %v252_v43 = vsel %vm234_vm1, %v250_v15, %v251_v59  ;;  %v254_v5 = vrot.slane %v724_v24, 6  ;;  %v256_v41 = vrot.slane %v732_v27, 6 }
  0x29   :  { %v321_v14 = vsel %vm234_vm1, 0.0, %v253_v8  ;;  %v1285_v58 = vmax.f32 %v710_v18, %v804_v2  ;;  %v370_v53 = vmax.f32 %v985_v13, %v969_v7  ;;  %v400_v63 = vmax.f32 %v368_v62, %v332_v0 }
  0x2a   :  { %v430_v60 = vsub.f32 1.0, %v398_v26  ;;  %v1286_v39 = vmax.f32 %v718_v21, %v867_v51  ;;  %v371_v15 = vmax.f32 %v990_v4, %v974_v45  ;;  %v401_v46 = vmax.f32 %v369_v49, %v333_v9 }
  0x2b   :  { %v1001_v6 = vmax.f32 %v1285_v58, %v249_v19  ;;  %v431_v11 = vsub.f32 1.0, %v399_v40  ;;  %v460_v18 = vsel %vm459_vm2, %v427_v54, 0.0  ;;  %v461_v2 = vsel %vm459_vm2, %v428_v42, 0.0 }
  0x2c   :  { %v1008_v59 = vmax.f32 %v1286_v39, %v320_v12  ;;  %v463_v25 = vsel %vm459_vm2, %v429_v31, 0.0  ;;  %v255_v0 = vsel %vm234_vm1, %v253_v8, %v254_v5  ;;  %v257_v62 = vrot.slane %v734_v28, 6 }
  0x2d   :  { %v1287_v21 = vmax.f32 %v720_v22, %v807_v3  ;;  %v462_v26 = vadd.f32 %v461_v2, %v460_v18  ;;  %v372_v9 = vmax.f32 %v1001_v6, %v985_v13  ;;  %v402_v40 = vmax.f32 %v370_v53, %v334_v48 }
  0x2e   :  { %v432_v49 = vsub.f32 1.0, %v400_v63  ;;  %v465_v54 = vsel %vm459_vm2, %v430_v60, 0.0  ;;  %v259_v42 = vrot.slane %v736_v29, 6  ;;  %v322_v31 = vsel %vm234_vm1, 0.0, %v256_v41 }
  0x2f   :  { %v1020_v51 = vmax.f32 %v1287_v21, %v252_v43  ;;  %v1288_v8 = vmax.f32 %v722_v23, %v870_v47  ;;  %v464_v22 = vadd.f32 %v463_v25, %v462_v26  ;;  %v373_v43 = vmax.f32 %v1008_v59, %v990_v4 }
  0x30   :  { %v403_v3 = vmax.f32 %v371_v15, %v956_v10  ;;  %v433_v12 = vsub.f32 1.0, %v401_v46  ;;  %v467_v48 = vsel %vm459_vm2, %v431_v11, 0.0  ;;  %v258_v5 = vsel %vm234_vm1, %v256_v41, %v257_v62 }
  0x31   :  { %v1030_v19 = vmax.f32 %v1288_v8, %v321_v14  ;;  %v260_v58 = vrot.slane %v738_v30, 6  ;;  %v1289_v53 = vmax.f32 %v724_v24, %v816_v20  ;;  %v466_v23 = vadd.f32 %v465_v54, %v464_v22 }
  0x32   :  { %v374_v47 = vmax.f32 %v1020_v51, %v1001_v6  ;;  %v404_v14 = vmax.f32 %v372_v9, %v969_v7  ;;  %v434_v60 = vsub.f32 1.0, %v402_v40  ;;  %v469_v10 = vsel %vm459_vm2, %v432_v49, 0.0 }
  0x33   :  { %v1041_v63 = vmax.f32 %v1289_v53, %v255_v0  ;;  %v262_v39 = vrot.slane %v743_v32, 6  ;;  %v323_v41 = vsel %vm234_vm1, 0.0, %v259_v42  ;;  %v1290_v15 = vmax.f32 %v732_v27, %v873_v44 }
  0x34   :  { %v468_v24 = vadd.f32 %v467_v48, %v466_v23  ;;  %v375_v20 = vmax.f32 %v1030_v19, %v1008_v59  ;;  %v405_v11 = vmax.f32 %v373_v43, %v974_v45  ;;  %v435_v18 = vsub.f32 1.0, %v403_v3 }
  0x35   :  { %v1052_v46 = vmax.f32 %v1290_v15, %v322_v31  ;;  %v471_v7 = vsel %vm459_vm2, %v433_v12, 0.0  ;;  %v261_v2 = vsel %vm234_vm1, %v259_v42, %v260_v58  ;;  %v263_v25 = vrot.slane %v745_v33, 6 }
  0x36   :  { %v1291_v0 = vmax.f32 %v734_v28, %v822_v36  ;;  %v470_v27 = vadd.f32 %v469_v10, %v468_v24  ;;  %v376_v44 = vmax.f32 %v1041_v63, %v1020_v51  ;;  %v406_v21 = vmax.f32 %v374_v47, %v985_v13 }
  0x37   :  { %v436_v26 = vsub.f32 1.0, %v404_v14  ;;  %v473_v45 = vsel %vm459_vm2, %v434_v60, 0.0  ;;  %v265_v9 = vrot.slane %v747_v34, 6  ;;  %v324_v40 = vsel %vm234_vm1, 0.0, %v262_v39 }
  0x38   :  { %v1063_v62 = vmax.f32 %v1291_v0, %v258_v5  ;;  %v1292_v49 = vmax.f32 %v736_v29, %v876_v55  ;;  %v472_v28 = vadd.f32 %v471_v7, %v470_v27  ;;  %v377_v36 = vmax.f32 %v1052_v46, %v1030_v19 }
  0x39   :  { %v407_v42 = vmax.f32 %v375_v20, %v990_v4  ;;  %v437_v31 = vsub.f32 1.0, %v405_v11  ;;  %v475_v13 = vsel %vm459_vm2, %v435_v18, 0.0  ;;  %v264_v8 = vsel %vm234_vm1, %v262_v39, %v263_v25 }
  0x3a   :  { %v1074_v54 = vmax.f32 %v1292_v49, %v323_v41  ;;  %v266_v22 = vrot.slane %v749_v35, 6  ;;  %v1293_v43 = vmax.f32 %v738_v30, %v832_v61  ;;  %v474_v29 = vadd.f32 %v473_v45, %v472_v28 }
  0x3b   :  { %v378_v55 = vmax.f32 %v1063_v62, %v1041_v63  ;;  %v408_v12 = vmax.f32 %v376_v44, %v1001_v6  ;;  %v438_v48 = vsub.f32 1.0, %v406_v21  ;;  %v477_v4 = vsel %vm459_vm2, %v436_v26, 0.0  ;;  %v1297_v44 = vld [vmem:[#allocation13_spill] sm:$0xff] }
  0x3c   :  { %v1085_v3 = vmax.f32 %v1293_v43, %v261_v2  ;;  %v268_v5 = vrot.slane %v754_v37, 6  ;;  %v325_v58 = vsel %vm234_vm1, 0.0, %v265_v9  ;;  %v1294_v53 = vmax.f32 %v743_v32, %v879_v56 }
  0x3d   :  { %v476_v30 = vadd.f32 %v475_v13, %v474_v29  ;;  %v379_v61 = vmax.f32 %v1074_v54, %v1052_v46  ;;  %v409_v47 = vmax.f32 %v377_v36, %v1008_v59  ;;  %v439_v14 = vsub.f32 1.0, %v407_v42  ;;  %v1300_v36 = vld [vmem:[#allocation19_spill] sm:$0xff]  ;;  %v1302_v29 = vld [vmem:[#allocation8_spill] sm:$0xff] }
  0x3e   :  { %v1096_v23 = vmax.f32 %v1294_v53, %v324_v40  ;;  %v479_v6 = vsel %vm459_vm2, %v437_v31, 0.0  ;;  %v267_v60 = vsel %vm234_vm1, %v265_v9, %v266_v22  ;;  %v269_v10 = vrot.slane %v756_v38, 6  ;;  %v1299_v40 = vld [vmem:[#allocation7_spill] sm:$0xff] }
  0x3f   :  { %v1295_v39 = vmax.f32 %v745_v33, %v835_v1  ;;  %v478_v32 = vadd.f32 %v477_v4, %v476_v30  ;;  %v380_v56 = vmax.f32 %v1085_v3, %v1063_v62  ;;  %v410_v15 = vmax.f32 %v378_v55, %v1020_v51  ;;  %v1305_v30 = vld [vmem:[#allocation9_spill] sm:$0xff] }
  0x40   :  { %v440_v24 = vsub.f32 1.0, %v408_v12  ;;  %v481_v59 = vsel %vm459_vm2, %v438_v48, 0.0  ;;  %v271_v20 = vrot.slane %v1277_v50, 6  ;;  %v326_v11 = vsel %vm234_vm1, 0.0, %v268_v5  ;;  %v1303_v12 = vld [vmem:[#allocation14_spill] sm:$0xff] }
  0x41   :  { %v1107_v41 = vmax.f32 %v1295_v39, %v264_v8  ;;  %v1296_v18 = vmax.f32 %v747_v34, %v882_v57  ;;  %v480_v33 = vadd.f32 %v479_v6, %v478_v32  ;;  %v381_v1 = vmax.f32 %v1096_v23, %v1074_v54 }
  0x42   :  { %v411_v2 = vmax.f32 %v379_v61, %v1030_v19  ;;  %v441_v25 = vsub.f32 1.0, %v409_v47  ;;  %v483_v51 = vsel %vm459_vm2, %v439_v14, 0.0  ;;  %v270_v0 = vsel %vm234_vm1, %v268_v5, %v269_v10  ;;  %v1306_v14 = vld [vmem:[#allocation20_spill] sm:$0xff] }
  0x43   :  { %v1118_v7 = vmax.f32 %v1296_v18, %v325_v58  ;;  %v272_v27 = vrot.slane %v1278_v16, 6  ;;  %v1298_v21 = vmax.f32 %v749_v35, %v1297_v44  ;;  %v482_v34 = vadd.f32 %v481_v59, %v480_v33 }
  0x44   :  { %v382_v57 = vmax.f32 %v1107_v41, %v1085_v3  ;;  %v412_v45 = vmax.f32 %v380_v56, %v1041_v63  ;;  %v442_v9 = vsub.f32 1.0, %v410_v15  ;;  %v485_v19 = vsel %vm459_vm2, %v440_v24, 0.0  ;;  %v1308_v24 = vld [vmem:[#allocation15_spill] sm:$0xff] }
  0x45   :  { %v1129_v26 = vmax.f32 %v1298_v21, %v267_v60  ;;  %v274_v49 = vrot.slane %v1299_v40, 6  ;;  %v327_v28 = vsel %vm234_vm1, 0.0, %v271_v20  ;;  %v1301_v42 = vmax.f32 %v754_v37, %v1300_v36 }
  0x46   :  { %v484_v35 = vadd.f32 %v483_v51, %v482_v34  ;;  %v383_v13 = vmax.f32 %v1118_v7, %v1096_v23  ;;  %v413_v8 = vmax.f32 %v381_v1, %v1052_v46  ;;  %v443_v22 = vsub.f32 1.0, %v411_v2  ;;  %v1310_v1 = vld [vmem:[#allocation11_spill] sm:$0xff]  ;;  %v1311_v51 = vld [vmem:[#allocation21_spill] sm:$0xff] }
  0x47   :  { %v1140_v31 = vmax.f32 %v1301_v42, %v326_v11  ;;  %v487_v63 = vsel %vm459_vm2, %v441_v25, 0.0  ;;  %v273_v43 = vsel %vm234_vm1, %v271_v20, %v272_v27  ;;  %v275_v55 = vrot.slane %v1302_v29, 6 }
  0x48   :  { %v1304_v48 = vmax.f32 %v756_v38, %v1303_v12  ;;  %v486_v37 = vadd.f32 %v485_v19, %v484_v35  ;;  %v384_v5 = vmax.f32 %v1129_v26, %v1107_v41  ;;  %v414_v58 = vmax.f32 %v382_v57, %v1063_v62  ;;  %v1314_v19 = vld [vmem:[#allocation16_spill] sm:$0xff] }
  0x49   :  { %v444_v53 = vsub.f32 1.0, %v412_v45  ;;  %v489_v46 = vsel %vm459_vm2, %v442_v9, 0.0  ;;  %v277_v61 = vrot.slane %v1305_v30, 6  ;;  %v328_v47 = vsel %vm234_vm1, 0.0, %v274_v49  ;;  %v1313_v45 = vld [vmem:[#allocation12_spill] sm:$0xff] }
  0x4a   :  { %v1151_v4 = vmax.f32 %v1304_v48, %v270_v0  ;;  %v1307_v6 = vmax.f32 %v1277_v50, %v1306_v14  ;;  %v488_v38 = vadd.f32 %v487_v63, %v486_v37  ;;  %v385_v10 = vmax.f32 %v1140_v31, %v1118_v7  ;;  %v1317_v63 = vld [vmem:[#allocation22_spill] sm:$0xff] }
  0x4b   :  { %v415_v39 = vmax.f32 %v383_v13, %v1074_v54  ;;  %v445_v32 = vsub.f32 1.0, %v413_v8  ;;  %v491_v62 = vsel %vm459_vm2, %v443_v22, 0.0  ;;  %v276_v56 = vsel %vm234_vm1, %v274_v49, %v275_v55 }
  0x4c   :  { %v355_v60 = vmax.f32 %v1307_v6, %v327_v28  ;;  %v278_v15 = vrot.slane %v1284_v17, 6  ;;  %v1309_v59 = vmax.f32 %v1278_v16, %v1308_v24  ;;  %v490_v11 = vadd.f32 %v489_v46, %v488_v38 }
  0x4d   :  { %v386_v50 = vmax.f32 %v1151_v4, %v1129_v26  ;;  %v416_v18 = vmax.f32 %v384_v5, %v1085_v3  ;;  %v446_v33 = vsub.f32 1.0, %v414_v58  ;;  %v493_v54 = vsel %vm459_vm2, %v444_v53, 0.0 }
  0x4e   :  { %v356_v20 = vmax.f32 %v1309_v59, %v273_v43  ;;  %v280_v2 = vrot.slane %v1310_v1, 6  ;;  %v329_v25 = vsel %vm234_vm1, 0.0, %v277_v61  ;;  %v1312_v0 = vmax.f32 %v1299_v40, %v1311_v51 }
  0x4f   :  { %v492_v44 = vadd.f32 %v491_v62, %v490_v11  ;;  %v387_v16 = vmax.f32 %v355_v60, %v1140_v31  ;;  %v417_v21 = vmax.f32 %v385_v10, %v1096_v23  ;;  %v447_v34 = vsub.f32 1.0, %v415_v39  ;;  %v1316_v23 = vld [vmem:[#allocation23_spill] sm:$0xff] }
  0x50   :  { %v357_v27 = vmax.f32 %v1312_v0, %v328_v47  ;;  %v495_v57 = vsel %vm459_vm2, %v445_v32, 0.0  ;;  %v279_v3 = vsel %vm234_vm1, %v277_v61, %v278_v15  ;;  %v281_v9 = vrot.slane %v1313_v45, 6 }
  0x51   :  { %v1315_v49 = vmax.f32 %v1302_v29, %v1314_v19  ;;  %v494_v36 = vadd.f32 %v493_v54, %v492_v44  ;;  %v388_v40 = vmax.f32 %v356_v20, %v1151_v4  ;;  %v418_v42 = vmax.f32 %v386_v50, %v1107_v41  ;;  %v1319_v41 = vld [vmem:[#allocation18_spill] sm:$0xff] }
  0x52   :  { %v448_v35 = vsub.f32 1.0, %v416_v18  ;;  %v497_v13 = vsel %vm459_vm2, %v446_v33, 0.0  ;;  %v232_v8 = vmax.f32 %v1310_v1, %v1316_v23  ;;  %v330_v22 = vsel %vm234_vm1, 0.0, %v280_v2 }
  0x53   :  { %v358_v28 = vmax.f32 %v1315_v49, %v276_v56  ;;  %v1318_v43 = vmax.f32 %v1305_v30, %v1317_v63  ;;  %v496_v12 = vadd.f32 %v495_v57, %v494_v36  ;;  %v389_v29 = vmax.f32 %v357_v27, %v355_v60 }
  0x54   :  { %v419_v48 = vmax.f32 %v387_v16, %v1118_v7  ;;  %v449_v37 = vsub.f32 1.0, %v417_v21  ;;  %v499_v5 = vsel %vm459_vm2, %v447_v34, 0.0  ;;  %v233_v58 = vmax.f32 %v1313_v45, %v1319_v41 }
  0x55   :  { %v359_v55 = vmax.f32 %v1318_v43, %v329_v25  ;;  %v282_v53 = vsel %vm234_vm1, %v280_v2, %v281_v9  ;;  %v1320_v46 = vmax.f32 %v1284_v17, %v1283_v52  ;;  %v498_v47 = vadd.f32 %v497_v13, %v496_v12 }
  0x56   :  { %v390_v14 = vmax.f32 %v358_v28, %v356_v20  ;;  %v420_v30 = vmax.f32 %v388_v40, %v1129_v26  ;;  %v450_v6 = vsub.f32 1.0, %v418_v42  ;;  %v501_v38 = vsel %vm459_vm2, %v448_v35, 0.0 }
  0x57   :  { %v360_v61 = vmax.f32 %v1320_v46, %v279_v3  ;;  %v361_v7 = vmax.f32 %v232_v8, %v330_v22  ;;  %v500_v10 = vadd.f32 %v499_v5, %v498_v47  ;;  %v391_v39 = vmax.f32 %v359_v55, %v357_v27 }
  0x58   :  { %v421_v32 = vmax.f32 %v389_v29, %v1140_v31  ;;  %v451_v62 = vsub.f32 1.0, %v419_v48  ;;  %v503_v56 = vsel %vm459_vm2, %v449_v37, 0.0  ;;  %v362_v15 = vmax.f32 %v233_v58, %v282_v53 }
  0x59   :  { %v502_v24 = vadd.f32 %v501_v38, %v500_v10  ;;  %v392_v59 = vmax.f32 %v360_v61, %v358_v28  ;;  %v422_v17 = vmax.f32 %v390_v14, %v1151_v4  ;;  %v452_v52 = vsub.f32 1.0, %v420_v30 }
  0x5a   :  { %v505_v11 = vsel %vm459_vm2, %v450_v6, 0.0  ;;  %v393_v50 = vmax.f32 %v361_v7, %v359_v55  ;;  %v423_v18 = vmax.f32 %v391_v39, %v355_v60  ;;  %v453_v33 = vsub.f32 1.0, %v421_v32 }
  0x5b   :  { %v504_v26 = vadd.f32 %v503_v56, %v502_v24  ;;  %v507_v54 = vsel %vm459_vm2, %v451_v62, 0.0  ;;  %v394_v2 = vmax.f32 %v362_v15, %v360_v61  ;;  %v424_v31 = vmax.f32 %v392_v59, %v356_v20 }
  0x5c   :  { %v454_v25 = vsub.f32 1.0, %v422_v17  ;;  %v509_v51 = vsel %vm459_vm2, %v452_v52, 0.0  ;;  %v425_v44 = vmax.f32 %v393_v50, %v357_v27  ;;  %v455_v16 = vsub.f32 1.0, %v423_v18 }
  0x5d   :  { %v506_v1 = vadd.f32 %v505_v11, %v504_v26  ;;  %v511_v4 = vsel %vm459_vm2, %v453_v33, 0.0  ;;  %v426_v34 = vmax.f32 %v394_v2, %v358_v28  ;;  %v456_v57 = vsub.f32 1.0, %v424_v31 }
  0x5e   :  { %v513_v3 = vsel %vm459_vm2, %v454_v25, 0.0  ;;  %v457_v45 = vsub.f32 1.0, %v425_v44  ;;  %v515_v9 = vsel %vm459_vm2, %v455_v16, 0.0 }
  0x5f   :  { %v508_v0 = vadd.f32 %v507_v54, %v506_v1  ;;  %v458_v49 = vsub.f32 1.0, %v426_v34  ;;  %v517_v20 = vsel %vm459_vm2, %v456_v57, 0.0 }
  0x60   :  { %v519_v40 = vsel %vm459_vm2, %v457_v45, 0.0 }
  0x61   :  { %v510_v21 = vadd.f32 %v509_v51, %v508_v0  ;;  %v521_v42 = vsel %vm459_vm2, %v458_v49, 0.0 }
  0x63   :  { %v512_v60 = vadd.f32 %v511_v4, %v510_v21 }
  0x65   :  { %v514_v19 = vadd.f32 %v513_v3, %v512_v60 }
  0x67   :  { %v516_v36 = vadd.f32 %v515_v9, %v514_v19 }
  0x69   :  { %v518_v27 = vadd.f32 %v517_v20, %v516_v36 }
  0x6b   :  { %v520_v35 = vadd.f32 %v519_v40, %v518_v27 }
  0x6d   :  { %v522_v13 = vadd.f32 %v521_v42, %v520_v35 }
  0x6f   :  { %523 = vadd.xlane.f32.xlu0 %v522_v13 }
  0xfc   :  { %v524_v28 = vpop.xlane.xlu0 %523 }
  0xfd   :  { %v525_v23 = vrot.slane %v524_v28, 4 }
  0xff   :  { %v526_v8 = vadd.f32 %v525_v23, %v524_v28 }
 0x101   :  { %v527_v22 = vrot.slane %v526_v8, 2 }
 0x103   :  { %v528_v63 = vadd.f32 %v527_v22, %v526_v8 }
 0x105   :  { %v529_v43 = vrot.slane %v528_v63, 1 }
 0x107   :  { %v530_v55 = vadd.f32 %v529_v43, %v528_v63 }
 0x109   :  { %627 = vpush %v530_v55 }
 0x13a   :  { %s628_s10 = spop %627 }
 0x13b   :  { %v532_v12 = vstv %s628_s10 }
 0x13c   :  { %533 = vst [vmem:[#allocation2] sm:$0xff] %v532_v12 }
 0x13d   :  { %641 = shalt.err (!%p638_p4)
}
 0x13e   :  { %s642_s14 = scalar_lea.hbm %s1232_s1, 128 }
 0x13f   :  { %p643_p5 = scmp.ne.s32.totalorder %s1232_s1, %s642_s14  ;;  %p646_p6 = scmp.lt.u32.totalorder %s642_s14, %s1232_s1 }
 0x141   :  { %p648_p7 = pnand %p646_p6, %p643_p5 }
 0x143   :  { %651 = shalt.err (!%p648_p7)
}
 0x144   :  { %543 = dma.vmem_to_hbm [thread:$0]  %s541_s9, 128, %s1232_s1, [#allocation3]  }
 0x145   :  { %652 = dma.done.wait [#allocation3], 128  }
 0x146   :  { %653 = vsyncadd [#allocation3], 4294967168 }
 0x147   :  { %547 = vsyncpa [#allocation3], 1 }

</bundles_post_ra>
